<compile_context>
chip_gen: v5e
topology: v5e:2x2
jax: 0.10.0
libtpu: 0.0.40
codegen_flags: <defaults>
</compile_context>

<pallas_src>
import functools

import jax
import jax.numpy as jnp
from jax.experimental import pallas as pl
from jax.experimental.pallas import tpu as pltpu


def _round_up(x: int, m: int) -> int:
    return ((x + m - 1) // m) * m


def _cdiv(a: int, b: int) -> int:
    return (a + b - 1) // b


def _mlp_kernel(x_ref, w1_ref, b1_ref, w2_ref, b2_ref, out_ref):
    # x_ref:   (tm, nfeat)        input dtype (f32/bf16), cast to bf16 here
    # w1_ref:  (nfeat, nhid_p)    bf16   b1_ref: (1, nhid_p)   f32
    # w2_ref:  (nhid_p, nclass_p) bf16   b2_ref: (1, nclass_p) f32
    # out_ref: (tm, nclass_p)     bf16
    x = x_ref[...].astype(w1_ref.dtype)            # f32 -> bf16 on the VPU

    # layer1: bf16 MXU matmul, f32 accumulation; bias + ReLU epilogue in f32.
    h = jnp.dot(x, w1_ref[...], preferred_element_type=jnp.float32)
    h = jnp.maximum(h + b1_ref[...], 0.0)

    # layer2: cast back to bf16 only for the MXU operands.
    h = h.astype(w2_ref.dtype)
    y = jnp.dot(h, w2_ref[...], preferred_element_type=jnp.float32)
    out_ref[...] = (y + b2_ref[...]).astype(out_ref.dtype)


def prepare_params(w1, b1, w2, b2, compute_dtype=jnp.bfloat16):
    """One-time parameter prep (hoisted out of the per-call hot path).

    Takes nn.Linear-layout weights (out_features, in_features) and biases.
    Returns (in, out)-layout bf16 weights with the hidden/class dims zero-padded
    to 128 lanes (lane-dense MXU outputs / unmasked stores), f32 row-vector
    biases, and the logical dims. The feature (contraction) dim is NOT padded,
    so the activation stream needs no wrapper-side padding pass.
    """
    nhid, nfeat = w1.shape
    nclass = w2.shape[0]
    nhid_p = _round_up(nhid, 128)
    nclass_p = _round_up(nclass, 128)

    # Zero-pad (never garbage-pad) so padded hidden/class columns stay exactly 0
    # through ReLU and the second matmul.
    w1_t = jnp.zeros((nfeat, nhid_p), compute_dtype)
    w1_t = w1_t.at[:, :nhid].set(w1.T.astype(compute_dtype))
    w2_t = jnp.zeros((nhid_p, nclass_p), compute_dtype)
    w2_t = w2_t.at[:nhid, :nclass].set(w2.T.astype(compute_dtype))
    b1_r = jnp.zeros((1, nhid_p), jnp.float32).at[0, :nhid].set(b1.astype(jnp.float32))
    b2_r = jnp.zeros((1, nclass_p), jnp.float32).at[0, :nclass].set(b2.astype(jnp.float32))

    return (w1_t, b1_r, w2_t, b2_r, (nfeat, nhid, nclass))


def _vmem_capacity_bytes() -> int:
    """Per-core VMEM capacity; conservative 64 MiB (v7x) fallback if unknown."""
    try:
        return int(pltpu.get_tpu_info().vmem_capacity_bytes)
    except Exception:
        return 64 * 1024 * 1024


@functools.partial(jax.jit, static_argnames=("nclass", "tm", "vmem_limit"))
def _mlp_forward_impl(x, w1_t, b1_r, w2_t, b2_r, *, nclass, tm, vmem_limit):
    n, nfeat = x.shape
    nhid_p = w1_t.shape[1]
    nclass_p = w2_t.shape[1]
    grid_n = _cdiv(n, tm)

    flops = 2 * n * (nfeat * nhid_p + nhid_p * nclass_p)
    bytes_accessed = (
        x.size * x.dtype.itemsize
        + w1_t.size * 2 + w2_t.size * 2 + b1_r.size * 4 + b2_r.size * 4
        + n * nclass_p * 2
    )

    out_p = pl.pallas_call(
        _mlp_kernel,
        out_shape=jax.ShapeDtypeStruct((n, nclass_p), jnp.bfloat16),
        grid=(grid_n,),
        in_specs=[
            pl.BlockSpec((tm, nfeat), lambda i: (i, 0)),          # x stream (pipelined)
            pl.BlockSpec((nfeat, nhid_p), lambda i: (0, 0)),      # W1^T (VMEM-resident)
            pl.BlockSpec((1, nhid_p), lambda i: (0, 0)),          # b1
            pl.BlockSpec((nhid_p, nclass_p), lambda i: (0, 0)),   # W2^T (VMEM-resident)
            pl.BlockSpec((1, nclass_p), lambda i: (0, 0)),        # b2
        ],
        out_specs=pl.BlockSpec((tm, nclass_p), lambda i: (i, 0)),
        compiler_params=pltpu.CompilerParams(
            dimension_semantics=("parallel",),
            vmem_limit_bytes=vmem_limit,
        ),
        cost_estimate=pl.CostEstimate(
            flops=flops, transcendentals=0, bytes_accessed=bytes_accessed),
    )(x, w1_t, b1_r, w2_t, b2_r)

    # Slice away class padding; cast the small logical output back to x.dtype.
    return out_p[:, :nclass].astype(x.dtype)


def mlp_forward(x, params, tm: int | None = None):
    """x: (N, nfeat) float; params from prepare_params()."""
    w1_t, b1_r, w2_t, b2_r, dims = params
    nfeat, _nhid, nclass = dims
    n = int(x.shape[0])
    nhid_p = int(w1_t.shape[1])
    nclass_p = int(w2_t.shape[1])
    in_bytes = jnp.dtype(x.dtype).itemsize

    # --- VMEM budget & per-generation tile sizing -------------------------------
    cap = _vmem_capacity_bytes()                      # 64 MiB (v7x) / 128 MiB (v5e,v6e)
    vmem_limit = min(int(cap * 0.78), 100 * 1024 * 1024)

    # Double-buffered weight/bias blocks (constant index_map) + per-row stream cost
    # (x tile + out tile double-buffered, plus f32/bf16 temporaries in the body).
    weight_bytes = 2 * (w1_t.size * 2 + w2_t.size * 2 + b1_r.size * 4 + b2_r.size * 4)
    row_bytes = (2 * nfeat * in_bytes        # x tile, double-buffered
                 + 2 * nclass_p * 2          # out tile, double-buffered (bf16)
                 + nfeat * 2                 # bf16 cast of x
                 + nhid_p * (4 + 2)          # h in f32 + bf16
                 + nclass_p * 4)             # y in f32
    headroom = 2 * 1024 * 1024
    avail = vmem_limit - weight_bytes - headroom
    assert avail >= 8 * row_bytes, (
        "MLP weights + minimal row tile exceed the VMEM budget; "
        "add a K-grid over nfeat for this problem size.")
    tm_cap = (avail // row_bytes) // 8 * 8

    if tm is None:
        # Bigger row tiles on 128-MiB parts (v5e/v6e) to amortize per-step overhead.
        tm = 2048 if cap >= 96 * 1024 * 1024 else 1024
    tm = min(tm, tm_cap)
    if n >= 512:
        # Keep >=2 grid steps so the "parallel" batch axis can split across
        # both TensorCores on v7x (no-op on single-TC v5e/v6e).
        tm = min(tm, _round_up(_cdiv(n, 2), 8))
    tm = max(8, min(tm, _round_up(n, 8)))
    tm = _round_up(tm, 8)

    return _mlp_forward_impl(x, w1_t, b1_r, w2_t, b2_r,
                             nclass=nclass, tm=tm, vmem_limit=vmem_limit)


def _torch_linear_init(key, out_features, in_features, dtype=jnp.float32):
    """Deterministic init matching nn.Linear.reset_parameters() distribution."""
    k_w, k_b = jax.random.split(key)
    bound = 1.0 / jnp.sqrt(jnp.array(in_features, dtype=dtype))
    w = jax.random.uniform(k_w, (out_features, in_features), dtype,
                           minval=-bound, maxval=bound)
    b = jax.random.uniform(k_b, (out_features,), dtype,
                           minval=-bound, maxval=bound)
    return w, b


if __name__ == "__main__":
    # Small, MLP-consistent shapes: batch=8 nodes, nfeat=32, nhid=64, nclass=16.
    N, NFEAT, NHID, NCLASS = 8, 32, 64, 16

    key = jax.random.PRNGKey(0)
    k_x, k_l1, k_l2 = jax.random.split(key, 3)

    x = jax.random.normal(k_x, (N, NFEAT), dtype=jnp.float32)
    w1, b1 = _torch_linear_init(k_l1, NHID, NFEAT)
    w2, b2 = _torch_linear_init(k_l2, NCLASS, NHID)

    params = prepare_params(w1, b1, w2, b2)          # one-time prep
    out = jax.block_until_ready(mlp_forward(x, params))

    # Reference: eval-mode forward in plain f32 JAX. Kernel uses bf16 MXU
    # operands / bf16 output with f32 accumulation, hence the tolerance.
    ref = jnp.maximum(x @ w1.T + b1, 0.0) @ w2.T + b2
    assert out.shape == (N, NCLASS)
    max_err = jnp.max(jnp.abs(out - ref))
    assert jnp.allclose(out, ref, atol=3e-2, rtol=3e-2), f"max abs err {max_err}"

    print("KERNEL_OK")
</pallas_src>

<mosaic_0001>
module attributes {stable_mosaic.version = 11 : i64} {
  func.func @_mlp_kernel(%arg0: i32, %arg1: memref<8x32xf32, #tpu.memory_space<vmem>>, %arg2: memref<32x128xbf16, #tpu.memory_space<vmem>>, %arg3: memref<1x128xf32, #tpu.memory_space<vmem>>, %arg4: memref<128x128xbf16, #tpu.memory_space<vmem>>, %arg5: memref<1x128xf32, #tpu.memory_space<vmem>>, %arg6: memref<8x128xbf16, #tpu.memory_space<vmem>>) attributes {dimension_semantics = [#tpu.dimension_semantics<parallel>], iteration_bounds = array<i64: 1>, scalar_prefetch = 0 : i64, scratch_operands = 0 : i64, tpu.core_type = #tpu.core_type<tc>, window_params = [{transform_indices = @transform_0, window_bounds = array<i64: 8, 32>}, {pipeline_mode = #tpu.pipeline_mode<synchronous>, transform_indices = @transform_1, window_bounds = array<i64: 32, 128>}, {pipeline_mode = #tpu.pipeline_mode<synchronous>, transform_indices = @transform_2, window_bounds = array<i64: 1, 128>}, {pipeline_mode = #tpu.pipeline_mode<synchronous>, transform_indices = @transform_3, window_bounds = array<i64: 128, 128>}, {pipeline_mode = #tpu.pipeline_mode<synchronous>, transform_indices = @transform_4, window_bounds = array<i64: 1, 128>}, {transform_indices = @transform_5, window_bounds = array<i64: 8, 128>}]} {
    %c0 = arith.constant 0 : index
    %c0_0 = arith.constant 0 : index
    %0 = vector.load %arg1[%c0, %c0_0] : memref<8x32xf32, #tpu.memory_space<vmem>>, vector<8x32xf32>
    %1 = arith.truncf %0 : vector<8x32xf32> to vector<8x32xbf16>
    %c0_1 = arith.constant 0 : index
    %c0_2 = arith.constant 0 : index
    %2 = vector.load %arg2[%c0_1, %c0_2] : memref<32x128xbf16, #tpu.memory_space<vmem>>, vector<32x128xbf16>
    %cst = arith.constant dense<0.000000e+00> : vector<8x128xf32>
    %3 = tpu.matmul %1, %2, %cst {dimension_numbers = #tpu.dot_dimension_numbers<[1], [0], [0], [1], [0, 0, 1, 1], [], []>} : vector<8x32xbf16>, vector<32x128xbf16>, vector<8x128xf32> -> vector<8x128xf32>
    %c0_3 = arith.constant 0 : index
    %c0_4 = arith.constant 0 : index
    %4 = vector.load %arg3[%c0_3, %c0_4] : memref<1x128xf32, #tpu.memory_space<vmem>>, vector<1x128xf32>
    %5 = vector.broadcast %4 : vector<1x128xf32> to vector<8x128xf32>
    %6 = arith.addf %3, %5 : vector<8x128xf32>
    %cst_5 = arith.constant 0.000000e+00 : f32
    %7 = vector.broadcast %cst_5 : f32 to vector<8x128xf32>
    %8 = arith.maximumf %6, %7 : vector<8x128xf32>
    %9 = arith.truncf %8 : vector<8x128xf32> to vector<8x128xbf16>
    %c0_6 = arith.constant 0 : index
    %c0_7 = arith.constant 0 : index
    %10 = vector.load %arg4[%c0_6, %c0_7] : memref<128x128xbf16, #tpu.memory_space<vmem>>, vector<128x128xbf16>
    %cst_8 = arith.constant dense<0.000000e+00> : vector<8x128xf32>
    %11 = tpu.matmul %9, %10, %cst_8 {dimension_numbers = #tpu.dot_dimension_numbers<[1], [0], [0], [1], [0, 0, 1, 1], [], []>} : vector<8x128xbf16>, vector<128x128xbf16>, vector<8x128xf32> -> vector<8x128xf32>
    %c0_9 = arith.constant 0 : index
    %c0_10 = arith.constant 0 : index
    %12 = vector.load %arg5[%c0_9, %c0_10] : memref<1x128xf32, #tpu.memory_space<vmem>>, vector<1x128xf32>
    %13 = vector.broadcast %12 : vector<1x128xf32> to vector<8x128xf32>
    %14 = arith.addf %11, %13 : vector<8x128xf32>
    %15 = arith.truncf %14 : vector<8x128xf32> to vector<8x128xbf16>
    %c0_11 = arith.constant 0 : index
    %c0_12 = arith.constant 0 : index
    %16 = vector.load %arg6[%c0_11, %c0_12] : memref<8x128xbf16, #tpu.memory_space<vmem>>, vector<8x128xbf16>
    tpu.vector_store %arg6[%c0_11, %c0_12], %15 {strides = array<i32>} : memref<8x128xbf16, #tpu.memory_space<vmem>>, vector<8x128xbf16>,
    return
  }
  func.func @transform_0(%arg0: i32) -> (i32, i32) {
    %c0_i32 = arith.constant 0 : i32
    %c0_i32_0 = arith.constant 0 : i32
    return %arg0, %c0_i32 : i32, i32
  }
  func.func @transform_1(%arg0: i32) -> (i32, i32) {
    %c0_i32 = arith.constant 0 : i32
    %c0_i32_0 = arith.constant 0 : i32
    %c0_i32_1 = arith.constant 0 : i32
    return %c0_i32, %c0_i32_0 : i32, i32
  }
  func.func @transform_2(%arg0: i32) -> (i32, i32) {
    %c0_i32 = arith.constant 0 : i32
    %c0_i32_0 = arith.constant 0 : i32
    %c0_i32_1 = arith.constant 0 : i32
    return %c0_i32, %c0_i32_0 : i32, i32
  }
  func.func @transform_3(%arg0: i32) -> (i32, i32) {
    %c0_i32 = arith.constant 0 : i32
    %c0_i32_0 = arith.constant 0 : i32
    %c0_i32_1 = arith.constant 0 : i32
    return %c0_i32, %c0_i32_0 : i32, i32
  }
  func.func @transform_4(%arg0: i32) -> (i32, i32) {
    %c0_i32 = arith.constant 0 : i32
    %c0_i32_0 = arith.constant 0 : i32
    %c0_i32_1 = arith.constant 0 : i32
    return %c0_i32, %c0_i32_0 : i32, i32
  }
  func.func @transform_5(%arg0: i32) -> (i32, i32) {
    %c0_i32 = arith.constant 0 : i32
    %c0_i32_0 = arith.constant 0 : i32
    return %arg0, %c0_i32 : i32, i32
  }
}

</mosaic_0001>

<bundles_post_ra>
// kernel: _mlp_forward_impl.1
= control target key start
LH: loop header
LB: loop body
LE: loop exit
PB: predicated region body
PF: predicated region fallthrough
CT: control target
= control target key end

     0   :  { %10 = vsyncpa [#allocation3], 0  ;;  %s383_s0 = inlined_call_operand.hbm [shape: f32[8,32], index: 0, kind: input, shape index: {}]   ;;  %s384_s1 = inlined_call_operand.hbm [shape: bf16[32,128], index: 1, kind: input, shape index: {}]   ;;  %s385_s2 = inlined_call_operand.vmem [shape: f32[1,128], index: 2, kind: input, shape index: {}]   ;;  %s386_s3 = inlined_call_operand.hbm [shape: bf16[128,128], index: 3, kind: input, shape index: {}]   ;;  %s387_s4 = inlined_call_operand.vmem [shape: f32[1,128], index: 4, kind: input, shape index: {}]   ;;  %s388_s5 = inlined_call_operand.vmem [shape: bf16[8,128], index: 5, kind: output, shape index: {}]  }
   0x1   :  { %11 = vsyncpa [#allocation5], 0  ;;  %s27_s20 = sshll.u32 %s384_s1, 4  ;;  %s330_s21 = smov [#allocation4]   ;;  %s28_s20 = int_to_ptr.hbm [resolvable:$true] %s27_s20 }
   0x2   :  { %s29_s22 = sshll.u32 %s330_s21, 4  ;;  %s17_s25 = sshll.u32 %s383_s0, 4  ;;  %s30_s22 = int_to_ptr.vmem [resolvable:$true] %s29_s22  ;;  %s18_s25 = int_to_ptr.hbm [resolvable:$true] %s17_s25 }
   0x3   :  { %s331_s26 = smov 64   ;;  %s332_s27 = smov 4  }
   0x4   :  { %35 = dma.hbm_to_vmem [thread:$0]  %s28_s20, 256, %s30_s22, [#allocation5], %s331_s26, %s331_s26, %s332_s27  }
   0x5   :  { %s333_s28 = smov [#allocation2]   ;;  %s42_s7 = sshll.u32 %s386_s3, 4  ;;  %s43_s7 = int_to_ptr.hbm [resolvable:$true] %s42_s7 }
   0x6   :  { %s19_s29 = sshll.u32 %s333_s28, 4  ;;  %s334_s1 = smov [#allocation6]   ;;  %s20_s29 = int_to_ptr.vmem [resolvable:$true] %s19_s29 }
   0x7   :  { %22 = dma.hbm_to_vmem [thread:$0]  %s18_s25, 128, %s20_s29, [#allocation3]  }
   0x8   :  { %s44_s8 = sshll.u32 %s334_s1, 4  ;;  %s45_s8 = int_to_ptr.vmem [resolvable:$true] %s44_s8 }
   0x9   :  { %50 = dma.hbm_to_vmem [thread:$0]  %s43_s7, 1024, %s45_s8, [#allocation5], %s331_s26, %s331_s26, %s332_s27  }
   0xa   :  { %326 = dma.done.wait [#allocation3], 128  }
   0xb   :  { %327 = vsyncadd [#allocation3], 4294967168 }
   0xc   :  { %328 = dma.done.wait [#allocation5], 1280  }
   0xd   :  { %329 = vsyncadd [#allocation5], 4294966016  ;;  %v238_v0 = vld [vmem:[#allocation4 + $0x8] sm:$0xff]  ;;  %v237_v2 = vld [vmem:[#allocation4] sm:$0xff]  ;;  %vm88_vm0 = vcmask 261120  }
   0xe   :  { %v246_v1 = vld [vmem:[#allocation6 + $0x38] sm:$0xff]  ;;  %98 = vmatpush.bf16.msra.mxu0 %v238_v0  ;;  %v66_v3 = vld [vmem:[#allocation2] sm:$0xff]  ;;  %v245_v4 = vld [vmem:[#allocation6 + $0x30] sm:$0xff] }
   0xf   :  { %175 = vmatpush.bf16.msra.mxu1 %v246_v1  ;;  %v67_v5 = vpack.c.bf16 %v66_v3, %v66_v3  ;;  %v244_v6 = vld [vmem:[#allocation6 + $0x28] sm:$0xff]  ;;  %v243_v7 = vld [vmem:[#allocation6 + $0x20] sm:$0xff]  ;;  %v242_v8 = vld [vmem:[#allocation6 + $0x18] sm:$0xff] }
  0x10   :  { %v241_v9 = vld [vmem:[#allocation6 + $0x10] sm:$0xff]  ;;  %v240_v10 = vld [vmem:[#allocation6 + $0x8] sm:$0xff]  ;;  %v239_v11 = vld [vmem:[#allocation6] sm:$0xff] }
  0x11   :  { %v252_v12 = vld [vmem:[%s385_s2] ss:$0 sm:$0xff] }
  0x12   :  { %99 = vmatpush.bf16.msra.mxu0 %v237_v2  ;;  %v253_v18 = vld [vmem:[%s387_s4] ss:$0 sm:$0xff] }
  0x13   :  { %176 = vmatpush.bf16.msra.mxu1 %v245_v4 }
  0x15   :  { %204 = vmatmul.msk.bf16.vlgmr.msra.gmra.mxu0 %vm88_vm0, %v67_v5 }
  0x17   :  { %177 = vmatpush.bf16.msra.mxu1 %v244_v6 }
  0x1b   :  { %178 = vmatpush.bf16.msra.mxu1 %v243_v7 }
  0x1f   :  { %179 = vmatpush.bf16.msra.mxu1 %v242_v8 }
  0x23   :  { %180 = vmatpush.bf16.msra.mxu1 %v241_v9 }
  0x27   :  { %181 = vmatpush.bf16.msra.mxu1 %v240_v10 }
  0x2b   :  { %182 = vmatpush.bf16.msra.mxu1 %v239_v11 }
  0x92   :  { %v101_v13 = vpop.f32.mrf.mxu0 }
  0x93   :  { %v102_v14 = vadd.f32 %v252_v12, %v101_v13 }
  0x95   :  { %v105_v15 = vmax.f32 %v102_v14, 0.0 }
  0x97   :  { %v106_v16 = vpack.c.bf16 %v105_v15, %v105_v15 }
  0x99   :  { %183 = vmatmul.bf16.vlgmr.msra.gmra.mxu1 %v106_v16 }
  0x9a   :  { %v103_v17 = vpop.f32.mrf.mxu0 }
 0x116   :  { %v184_v19 = vpop.f32.mrf.mxu1 }
 0x117   :  { %v185_v20 = vadd.f32 %v253_v18, %v184_v19 }
 0x119   :  { %v188_v21 = vpack.c.bf16 %v185_v20, %v185_v20 }
 0x11b   :  { %189 = vst [vmem:[%s388_s5] sm:$0xf] %v188_v21 }
 0x11e   :  { %v186_v22 = vpop.f32.mrf.mxu1 }
 0x11f   :  { %194 = vsyncpa [#allocation3], 1 }
 0x120   :  { %195 = vsyncpa [#allocation5], 1 }

</bundles_post_ra>
